<compile_context>
chip_gen: v5e
topology: v5e:2x2
jax: 0.10.0
libtpu: 0.0.40
codegen_flags: <defaults>
</compile_context>

<pallas_src>
import functools

import jax
import jax.numpy as jnp
from jax.experimental import pallas as pl
from jax.experimental.pallas import tpu as pltpu


def _round_up(x: int, m: int) -> int:
    return ((x + m - 1) // m) * m


def _pick_tile(n: int, prefer: int) -> int:
    """Largest power-of-two tile in [128, prefer] whose padding waste stays modest."""
    t = prefer
    while t > 128:
        waste = _round_up(n, t) - n
        if waste <= max(t // 2, n // 8):
            return t
        t //= 2
    return 128


# ---------------------------------------------------------------------------
# Kernel 1: projection  P = H @ W   (bf16 in, f32 MXU accumulate, bf16 out)
# ---------------------------------------------------------------------------
def _project_kernel(h_ref, w_ref, p_ref):
    p_ref[...] = jnp.dot(
        h_ref[...], w_ref[...], preferred_element_type=jnp.float32
    ).astype(p_ref.dtype)


# ---------------------------------------------------------------------------
# Masked LayerNorm + ReLU epilogue (f32).  Both the mean and the variance are
# masked to the true d_out lanes, so padded feature lanes can never bias the
# statistics regardless of what the padding path produces.
# ---------------------------------------------------------------------------
def _layer_norm_relu(z, gamma, beta, d_out: int, eps: float):
    lane = jax.lax.broadcasted_iota(jnp.int32, z.shape, 1)
    valid = lane < d_out
    z = jnp.where(valid, z, 0.0)
    inv_d = 1.0 / d_out
    mean = jnp.sum(z, axis=-1, keepdims=True) * inv_d
    diff = jnp.where(valid, z - mean, 0.0)
    var = jnp.sum(diff * diff, axis=-1, keepdims=True) * inv_d
    zn = diff * jax.lax.rsqrt(var + eps)          # EUP rsqrt
    return jnp.maximum(zn * gamma + beta, 0.0)


# ---------------------------------------------------------------------------
# Kernel 2a: aggregation with a VMEM-resident P.
#   grid = (rows, K); A streamed as (tm, tk) bf16 tiles; P is fetched once
#   (constant index_map) and the relevant K-slab is sliced in VMEM.  The f32
#   output block is constant in k, so it doubles as the accumulator.
# ---------------------------------------------------------------------------
def _aggregate_resident_kernel(a_ref, p_ref, b_ref, g_ref, be_ref, o_ref, *,
                               tk: int, d_out: int, eps: float):
    k = pl.program_id(1)

    @pl.when(k == 0)
    def _init():
        o_ref[...] = jnp.zeros_like(o_ref)

    start = pl.multiple_of(k * tk, tk)
    o_ref[...] += jnp.dot(
        a_ref[...], p_ref[pl.ds(start, tk), :],
        preferred_element_type=jnp.float32)

    @pl.when(k == pl.num_programs(1) - 1)
    def _finalize():
        z = o_ref[...] + b_ref[...]
        o_ref[...] = _layer_norm_relu(z, g_ref[...], be_ref[...], d_out, eps)


# ---------------------------------------------------------------------------
# Kernel 2b: aggregation with streamed (tk, Dout) P slabs (large-N fallback).
# ---------------------------------------------------------------------------
def _aggregate_streamed_kernel(a_ref, p_ref, b_ref, g_ref, be_ref, o_ref, *,
                               d_out: int, eps: float):
    k = pl.program_id(1)

    @pl.when(k == 0)
    def _init():
        o_ref[...] = jnp.zeros_like(o_ref)

    o_ref[...] += jnp.dot(
        a_ref[...], p_ref[...], preferred_element_type=jnp.float32)

    @pl.when(k == pl.num_programs(1) - 1)
    def _finalize():
        z = o_ref[...] + b_ref[...]
        o_ref[...] = _layer_norm_relu(z, g_ref[...], be_ref[...], d_out, eps)


# ---------------------------------------------------------------------------
# Wrapper
# ---------------------------------------------------------------------------
def gcn_layer(adj, h, w, b, gamma, beta, *, eps: float = 1e-5):
    """adj: (N, N) dense weighted adjacency (adj[dst, src] = edge weight);
    h: (N, Din); w: (Din, Dout); b/gamma/beta: (Dout,). Returns (N, Dout) f32."""
    n, d_in = h.shape
    d_out = w.shape[1]
    f32, bf16 = jnp.float32, jnp.bfloat16

    # Lane-dense feature padding (multiple of 128); the LayerNorm is masked.
    d_in_p = _round_up(d_in, 128)
    d_out_p = _round_up(d_out, 128)

    # Decoupled row / K padding for the adjacency.
    tm = _pick_tile(n, 1024)
    while tm > 128 and _round_up(n, tm) // tm < 2:   # >=2 row tiles for v7x megacore
        tm //= 2
    tk = _pick_tile(n, 1024)
    n_rows_p = _round_up(n, tm)
    n_cols_p = _round_up(n, tk)

    # Host-side padding; cast to bf16 BEFORE padding (single cheap pass over A).
    def pad2(x, rows, cols):
        r, c = x.shape
        if (r, c) == (rows, cols):
            return x
        return jnp.pad(x, ((0, rows - r), (0, cols - c)))

    adj_p = pad2(adj.astype(bf16), n_rows_p, n_cols_p)
    h_p = pad2(h.astype(bf16), n_cols_p, d_in_p)
    w_p = pad2(w.astype(bf16), d_in_p, d_out_p)
    b_p = jnp.pad(b.astype(f32), (0, d_out_p - d_out)).reshape(1, d_out_p)
    g_p = jnp.pad(gamma.astype(f32), (0, d_out_p - d_out)).reshape(1, d_out_p)
    be_p = jnp.pad(beta.astype(f32), (0, d_out_p - d_out)).reshape(1, d_out_p)

    # ---- 1) P = H @ W  (reassociated projection, fat row tile) --------------
    tp = 128
    for cand in (4096, 2048, 1024, 512, 256):
        if n_cols_p % cand == 0 and cand * d_in_p * 2 <= (4 << 20):
            tp = cand
            break
    proj_vmem = (2 * tp * d_in_p * 2 + 2 * d_in_p * d_out_p * 2
                 + 2 * tp * d_out_p * 2 + (4 << 20))
    p = pl.pallas_call(
        _project_kernel,
        out_shape=jax.ShapeDtypeStruct((n_cols_p, d_out_p), bf16),
        grid=(n_cols_p // tp,),
        in_specs=[
            pl.BlockSpec((tp, d_in_p), lambda i: (i, 0)),
            pl.BlockSpec((d_in_p, d_out_p), lambda i: (0, 0)),
        ],
        out_specs=pl.BlockSpec((tp, d_out_p), lambda i: (i, 0)),
        compiler_params=pltpu.CompilerParams(
            dimension_semantics=("parallel",),
            vmem_limit_bytes=min(max(proj_vmem, 16 << 20), 64 << 20)),
    )(h_p, w_p)

    # ---- 2) out = ReLU(LayerNorm(A @ P + b)) ---------------------------------
    p_single = n_cols_p * d_out_p * 2            # bytes of one bf16 copy of P
    p_resident = p_single <= (4 << 20)           # resident up to ~16K nodes @ Dout<=128

    if p_resident:
        kernel = functools.partial(_aggregate_resident_kernel,
                                   tk=tk, d_out=d_out, eps=eps)
        p_spec = pl.BlockSpec((n_cols_p, d_out_p), lambda i, k: (0, 0))
        p_buf_bytes = 2 * p_single               # double-buffered but fetched once
        p_hbm_bytes = p_single
    else:
        kernel = functools.partial(_aggregate_streamed_kernel,
                                   d_out=d_out, eps=eps)
        p_spec = pl.BlockSpec((tk, d_out_p), lambda i, k: (k, 0))
        p_buf_bytes = 2 * tk * d_out_p * 2
        p_hbm_bytes = (n_rows_p // tm) * p_single  # re-read once per row tile

    vmem_needed = (2 * tm * tk * 2               # A double buffer (bf16)
                   + p_buf_bytes                 # P buffers
                   + 2 * tm * d_out_p * 4        # f32 output / accumulator blocks
                   + 6 * d_out_p * 4)            # bias / gamma / beta
    vmem_limit = min(max(vmem_needed + (4 << 20), 16 << 20), 64 << 20)

    cost = pl.CostEstimate(
        flops=2 * n_rows_p * n_cols_p * d_out_p,
        transcendentals=n_rows_p,
        bytes_accessed=(n_rows_p * n_cols_p * 2 + p_hbm_bytes
                        + n_rows_p * d_out_p * 4))

    out = pl.pallas_call(
        kernel,
        out_shape=jax.ShapeDtypeStruct((n_rows_p, d_out_p), f32),
        grid=(n_rows_p // tm, n_cols_p // tk),
        in_specs=[
            pl.BlockSpec((tm, tk), lambda i, k: (i, k)),        # A tile
            p_spec,                                             # P (resident or slab)
            pl.BlockSpec((1, d_out_p), lambda i, k: (0, 0)),    # bias
            pl.BlockSpec((1, d_out_p), lambda i, k: (0, 0)),    # gamma
            pl.BlockSpec((1, d_out_p), lambda i, k: (0, 0)),    # beta
        ],
        out_specs=pl.BlockSpec((tm, d_out_p), lambda i, k: (i, 0)),
        compiler_params=pltpu.CompilerParams(
            dimension_semantics=("parallel", "arbitrary"),
            vmem_limit_bytes=vmem_limit),
        cost_estimate=cost,
    )(adj_p, p, b_p, g_p, be_p)

    return out[:n, :d_out]


# ---------------------------------------------------------------------------
# References
# ---------------------------------------------------------------------------
def _reference_f32(adj, h, w, b, gamma, beta, eps=1e-5):
    hi = jax.lax.Precision.HIGHEST
    z = jnp.dot(jnp.dot(adj, h, precision=hi), w, precision=hi) + b[None, :]
    mean = z.mean(-1, keepdims=True)
    var = ((z - mean) ** 2).mean(-1, keepdims=True)
    zn = (z - mean) / jnp.sqrt(var + eps)
    return jnp.maximum(zn * gamma[None, :] + beta[None, :], 0.0)


def _reference_bf16(adj, h, w, b, gamma, beta, eps=1e-5):
    # Mirrors the kernel's bf16-input / f32-accumulate matmuls (reassociated).
    f = lambda x: x.astype(jnp.bfloat16).astype(jnp.float32)
    hi = jax.lax.Precision.HIGHEST
    p = jnp.dot(f(h), f(w), precision=hi).astype(jnp.bfloat16).astype(jnp.float32)
    z = jnp.dot(f(adj), p, precision=hi) + b[None, :]
    mean = z.mean(-1, keepdims=True)
    var = ((z - mean) ** 2).mean(-1, keepdims=True)
    zn = (z - mean) / jnp.sqrt(var + eps)
    return jnp.maximum(zn * gamma[None, :] + beta[None, :], 0.0)


def _make_case(key, n, d_in, d_out, random_affine):
    k_h, k_w, k_b, k_mask, k_ew, k_g, k_be = jax.random.split(key, 7)
    h = jax.random.normal(k_h, (n, d_in), dtype=jnp.float32)
    w = jax.random.normal(k_w, (d_in, d_out), dtype=jnp.float32) * (1.0 / jnp.sqrt(d_in))
    b = jax.random.normal(k_b, (d_out,), dtype=jnp.float32) * 0.01
    if random_affine:
        gamma = 1.0 + 0.1 * jax.random.normal(k_g, (d_out,), dtype=jnp.float32)
        beta = 0.05 * jax.random.normal(k_be, (d_out,), dtype=jnp.float32)
    else:
        gamma = jnp.ones((d_out,), dtype=jnp.float32)    # LayerNorm weight init
        beta = jnp.zeros((d_out,), dtype=jnp.float32)    # LayerNorm bias init
    # Deterministic random sparse graph -> dense weighted adjacency holding the
    # 'normalized_edge_weight' (row-normalized over incoming edges).
    mask = (jax.random.uniform(k_mask, (n, n)) < 0.3).astype(jnp.float32)
    mask = mask + jnp.eye(n, dtype=jnp.float32)
    raw_w = jax.random.uniform(k_ew, (n, n)) * mask
    adj = raw_w / jnp.maximum(raw_w.sum(axis=1, keepdims=True), 1e-6)
    return adj, h, w, b, gamma, beta


if __name__ == "__main__":
    key = jax.random.PRNGKey(0)
    k1, k2 = jax.random.split(key)

    # Case 1: matches the module's small config (in_sizes['_N']=32, out_sizes['_N']=32).
    # Case 2: non-128-multiple features + non-tile-aligned N to exercise padding/masking.
    cases = [
        (_make_case(k1, 16, 32, 32, random_affine=False), (16, 32)),
        (_make_case(k2, 200, 48, 40, random_affine=True), (200, 40)),
    ]

    for (adj, h, w, b, gamma, beta), (n, d_out) in cases:
        out = gcn_layer(adj, h, w, b, gamma, beta)
        out = jax.block_until_ready(out)
        assert out.shape == (n, d_out)

        # Tight check vs. a reference mimicking the kernel's bf16-in / f32-acc matmuls.
        ref_bf16 = _reference_bf16(adj, h, w, b, gamma, beta)
        assert jnp.allclose(out, ref_bf16, atol=5e-3, rtol=5e-3)

        # Loose check vs. the full-precision module semantics.
        ref_f32 = _reference_f32(adj, h, w, b, gamma, beta)
        assert jnp.allclose(out, ref_f32, atol=5e-2, rtol=5e-2)

    print("KERNEL_OK")
</pallas_src>

<mosaic_0001>
module attributes {stable_mosaic.version = 11 : i64} {
  func.func @_project_kernel(%arg0: i32, %arg1: memref<128x128xbf16, #tpu.memory_space<vmem>>, %arg2: memref<128x128xbf16, #tpu.memory_space<vmem>>, %arg3: memref<128x128xbf16, #tpu.memory_space<vmem>>) attributes {dimension_semantics = [#tpu.dimension_semantics<parallel>], iteration_bounds = array<i64: 1>, scalar_prefetch = 0 : i64, scratch_operands = 0 : i64, tpu.core_type = #tpu.core_type<tc>, window_params = [{transform_indices = @transform_0, window_bounds = array<i64: 128, 128>}, {pipeline_mode = #tpu.pipeline_mode<synchronous>, transform_indices = @transform_1, window_bounds = array<i64: 128, 128>}, {transform_indices = @transform_2, window_bounds = array<i64: 128, 128>}]} {
    %c0 = arith.constant 0 : index
    %c0_0 = arith.constant 0 : index
    %0 = vector.load %arg1[%c0, %c0_0] : memref<128x128xbf16, #tpu.memory_space<vmem>>, vector<128x128xbf16>
    %c0_1 = arith.constant 0 : index
    %c0_2 = arith.constant 0 : index
    %1 = vector.load %arg2[%c0_1, %c0_2] : memref<128x128xbf16, #tpu.memory_space<vmem>>, vector<128x128xbf16>
    %cst = arith.constant dense<0.000000e+00> : vector<128x128xf32>
    %2 = tpu.matmul %0, %1, %cst {dimension_numbers = #tpu.dot_dimension_numbers<[1], [0], [0], [1], [0, 0, 1, 1], [], []>} : vector<128x128xbf16>, vector<128x128xbf16>, vector<128x128xf32> -> vector<128x128xf32>
    %3 = arith.truncf %2 : vector<128x128xf32> to vector<128x128xbf16>
    %c0_3 = arith.constant 0 : index
    %c0_4 = arith.constant 0 : index
    %4 = vector.load %arg3[%c0_3, %c0_4] : memref<128x128xbf16, #tpu.memory_space<vmem>>, vector<128x128xbf16>
    tpu.vector_store %arg3[%c0_3, %c0_4], %3 {strides = array<i32>} : memref<128x128xbf16, #tpu.memory_space<vmem>>, vector<128x128xbf16>,
    return
  }
  func.func @transform_0(%arg0: i32) -> (i32, i32) {
    %c0_i32 = arith.constant 0 : i32
    %c0_i32_0 = arith.constant 0 : i32
    return %arg0, %c0_i32 : i32, i32
  }
  func.func @transform_1(%arg0: i32) -> (i32, i32) {
    %c0_i32 = arith.constant 0 : i32
    %c0_i32_0 = arith.constant 0 : i32
    %c0_i32_1 = arith.constant 0 : i32
    return %c0_i32, %c0_i32_0 : i32, i32
  }
  func.func @transform_2(%arg0: i32) -> (i32, i32) {
    %c0_i32 = arith.constant 0 : i32
    %c0_i32_0 = arith.constant 0 : i32
    return %arg0, %c0_i32 : i32, i32
  }
}

</mosaic_0001>

<bundles_post_ra>
// kernel: tpu_custom_call.1
= control target key start
LH: loop header
LB: loop body
LE: loop exit
PB: predicated region body
PF: predicated region fallthrough
CT: control target
= control target key end

     0   :  { %7 = vsyncpa [#allocation3], 0  ;;  %s545_s0 = inlined_call_operand.hbm [shape: bf16[128,128], index: 0, kind: input, shape index: {}]   ;;  %s546_s1 = inlined_call_operand.hbm [shape: bf16[128,128], index: 1, kind: input, shape index: {}]   ;;  %s547_s2 = inlined_call_operand.hbm [shape: bf16[128,128], index: 2, kind: output, shape index: {}]  }
   0x1   :  { %8 = vsyncpa [#allocation6], 0 }
   0x2   :  { %9 = vsyncpa [#allocation4], 0  ;;  %s14_s11 = sshll.u32 %s545_s0, 4  ;;  %s507_s12 = smov [#allocation2]   ;;  %s15_s11 = int_to_ptr.hbm [resolvable:$true] %s14_s11 }
   0x3   :  { %s16_s13 = sshll.u32 %s507_s12, 4  ;;  %s27_s16 = sshll.u32 %s546_s1, 4  ;;  %s17_s13 = int_to_ptr.vmem [resolvable:$true] %s16_s13  ;;  %s28_s16 = int_to_ptr.hbm [resolvable:$true] %s27_s16 }
   0x4   :  { %s508_s17 = smov 64   ;;  %s509_s18 = smov 4  }
   0x5   :  { %22 = dma.hbm_to_vmem [thread:$0]  %s15_s11, 1024, %s17_s13, [#allocation3], %s508_s17, %s508_s17, %s509_s18  }
   0x6   :  { %s510_s19 = smov [#allocation5]  }
   0x7   :  { %s29_s20 = sshll.u32 %s510_s19, 4  ;;  %s30_s20 = int_to_ptr.vmem [resolvable:$true] %s29_s20 }
   0x8   :  { %35 = dma.hbm_to_vmem [thread:$0]  %s28_s16, 1024, %s30_s20, [#allocation6], %s508_s17, %s508_s17, %s509_s18  }
   0x9   :  { %501 = dma.done.wait [#allocation3], 1024  }
   0xa   :  { %502 = vsyncadd [#allocation3], 4294966272 }
   0xb   :  { %503 = dma.done.wait [#allocation6], 1024  }
   0xc   :  { %504 = vsyncadd [#allocation6], 4294966272  ;;  %v352_v0 = vld [vmem:[#allocation5 + $0x38] sm:$0xff]  ;;  %v351_v1 = vld [vmem:[#allocation5 + $0x30] sm:$0xff]  ;;  %s511_s0 = smov [#allocation7]   ;;  %s259_s23 = sshll.u32 %s547_s2, 4  ;;  %s260_s23 = int_to_ptr.hbm [resolvable:$true] %s259_s23 }
   0xd   :  { %172 = vmatpush.bf16.msra.mxu0 %v352_v0  ;;  %400 = vmatpush.bf16.msra.mxu1 %v352_v0  ;;  %v350_v2 = vld [vmem:[#allocation5 + $0x28] sm:$0xff]  ;;  %v349_v3 = vld [vmem:[#allocation5 + $0x20] sm:$0xff]  ;;  %v348_v4 = vld [vmem:[#allocation5 + $0x18] sm:$0xff]  ;;  %s257_s1 = sshll.u32 %s511_s0, 4  ;;  %s258_s1 = int_to_ptr.vmem [resolvable:$true] %s257_s1 }
   0xe   :  { %401 = vmatpush.bf16.msra.mxu2 %v352_v0  ;;  %402 = vmatpush.bf16.msra.mxu3 %v352_v0  ;;  %v347_v5 = vld [vmem:[#allocation5 + $0x10] sm:$0xff]  ;;  %v346_v6 = vld [vmem:[#allocation5 + $0x8] sm:$0xff]  ;;  %v345_v7 = vld [vmem:[#allocation5] sm:$0xff] }
   0xf   :  { %v337_v8 = vld [vmem:[#allocation2] sm:$0xff]  ;;  %v339_v9 = vld [vmem:[#allocation2 + $0x10] sm:$0xff]  ;;  %v338_v12 = vld [vmem:[#allocation2 + $0x8] sm:$0xff] }
  0x10   :  { %v341_v10 = vld [vmem:[#allocation2 + $0x20] sm:$0xff]  ;;  %v343_v11 = vld [vmem:[#allocation2 + $0x30] sm:$0xff]  ;;  %v340_v13 = vld [vmem:[#allocation2 + $0x18] sm:$0xff] }
  0x11   :  { %173 = vmatpush.bf16.msra.mxu0 %v351_v1  ;;  %403 = vmatpush.bf16.msra.mxu1 %v351_v1  ;;  %v342_v14 = vld [vmem:[#allocation2 + $0x28] sm:$0xff]  ;;  %v344_v15 = vld [vmem:[#allocation2 + $0x38] sm:$0xff] }
  0x12   :  { %404 = vmatpush.bf16.msra.mxu2 %v351_v1  ;;  %405 = vmatpush.bf16.msra.mxu3 %v351_v1 }
  0x15   :  { %174 = vmatpush.bf16.msra.mxu0 %v350_v2  ;;  %406 = vmatpush.bf16.msra.mxu1 %v350_v2 }
  0x16   :  { %407 = vmatpush.bf16.msra.mxu2 %v350_v2  ;;  %408 = vmatpush.bf16.msra.mxu3 %v350_v2 }
  0x19   :  { %175 = vmatpush.bf16.msra.mxu0 %v349_v3  ;;  %409 = vmatpush.bf16.msra.mxu1 %v349_v3 }
  0x1a   :  { %410 = vmatpush.bf16.msra.mxu2 %v349_v3  ;;  %411 = vmatpush.bf16.msra.mxu3 %v349_v3 }
  0x1d   :  { %176 = vmatpush.bf16.msra.mxu0 %v348_v4  ;;  %412 = vmatpush.bf16.msra.mxu1 %v348_v4 }
  0x1e   :  { %413 = vmatpush.bf16.msra.mxu2 %v348_v4  ;;  %414 = vmatpush.bf16.msra.mxu3 %v348_v4 }
  0x21   :  { %177 = vmatpush.bf16.msra.mxu0 %v347_v5  ;;  %415 = vmatpush.bf16.msra.mxu1 %v347_v5 }
  0x22   :  { %416 = vmatpush.bf16.msra.mxu2 %v347_v5  ;;  %417 = vmatpush.bf16.msra.mxu3 %v347_v5 }
  0x25   :  { %178 = vmatpush.bf16.msra.mxu0 %v346_v6  ;;  %418 = vmatpush.bf16.msra.mxu1 %v346_v6 }
  0x26   :  { %419 = vmatpush.bf16.msra.mxu2 %v346_v6  ;;  %420 = vmatpush.bf16.msra.mxu3 %v346_v6 }
  0x29   :  { %179 = vmatpush.bf16.msra.mxu0 %v345_v7  ;;  %421 = vmatpush.bf16.msra.mxu1 %v345_v7 }
  0x2a   :  { %422 = vmatpush.bf16.msra.mxu2 %v345_v7  ;;  %423 = vmatpush.bf16.msra.mxu3 %v345_v7 }
  0x2c   :  { %180 = vmatmul.bf16.vlgmr.msra.gmra.mxu0 %v337_v8  ;;  %190 = vmatmul.bf16.vlgmr.msra.gmra.mxu1 %v339_v9 }
  0x2d   :  { %200 = vmatmul.bf16.vlgmr.msra.gmra.mxu2 %v341_v10  ;;  %210 = vmatmul.bf16.vlgmr.msra.gmra.mxu3 %v343_v11 }
  0x3c   :  { %185 = vmatmul.bf16.gmra.mxu0 %v338_v12  ;;  %195 = vmatmul.bf16.gmra.mxu1 %v340_v13 }
  0x3d   :  { %205 = vmatmul.bf16.gmra.mxu2 %v342_v14  ;;  %215 = vmatmul.bf16.gmra.mxu3 %v344_v15 }
  0xa9   :  { %v181_v16 = vpop.f32.mrf.mxu0  ;;  %v191_v17 = vpop.f32.mrf.mxu1 }
  0xb0   :  { %v201_v18 = vpop.f32.mrf.mxu2  ;;  %v211_v19 = vpop.f32.mrf.mxu3 }
  0xb1   :  { %v183_v20 = vpop.f32.mrf.mxu0  ;;  %v193_v21 = vpop.f32.mrf.mxu1 }
  0xb2   :  { %v356_v22 = vpack.c.bf16 %v183_v20, %v181_v16  ;;  %v366_v23 = vpack.c.bf16 %v193_v21, %v191_v17 }
  0xb4   :  { %357 = vst [vmem:[#allocation7] sm:$0xff] %v356_v22  }
  0xb5   :  { %394 = vst [vmem:[#allocation7 + $0x10] sm:$0xff] %v366_v23  }
  0xb8   :  { %v203_v24 = vpop.f32.mrf.mxu2  ;;  %v213_v25 = vpop.f32.mrf.mxu3 }
  0xb9   :  { %v376_v26 = vpack.c.bf16 %v203_v24, %v201_v18  ;;  %v386_v27 = vpack.c.bf16 %v213_v25, %v211_v19  ;;  %v186_v28 = vpop.f32.mrf.mxu0  ;;  %v196_v29 = vpop.f32.mrf.mxu1 }
  0xbb   :  { %396 = vst [vmem:[#allocation7 + $0x20] sm:$0xff] %v376_v26  }
  0xbc   :  { %398 = vst [vmem:[#allocation7 + $0x30] sm:$0xff] %v386_v27  }
  0xc0   :  { %v206_v30 = vpop.f32.mrf.mxu2  ;;  %v216_v31 = vpop.f32.mrf.mxu3 }
  0xc1   :  { %v188_v32 = vpop.f32.mrf.mxu0  ;;  %v198_v33 = vpop.f32.mrf.mxu1 }
  0xc2   :  { %v361_v34 = vpack.c.bf16 %v188_v32, %v186_v28  ;;  %v371_v35 = vpack.c.bf16 %v198_v33, %v196_v29 }
  0xc4   :  { %393 = vst [vmem:[#allocation7 + $0x8] sm:$0xff] %v361_v34  }
  0xc5   :  { %395 = vst [vmem:[#allocation7 + $0x18] sm:$0xff] %v371_v35  }
  0xc8   :  { %v208_v36 = vpop.f32.mrf.mxu2  ;;  %v218_v37 = vpop.f32.mrf.mxu3 }
  0xc9   :  { %v381_v38 = vpack.c.bf16 %v208_v36, %v206_v30  ;;  %v391_v39 = vpack.c.bf16 %v218_v37, %v216_v31 }
  0xcb   :  { %397 = vst [vmem:[#allocation7 + $0x28] sm:$0xff] %v381_v38  }
  0xcc   :  { %399 = vst [vmem:[#allocation7 + $0x38] sm:$0xff] %v391_v39  }
  0xcd   :  { %265 = dma.vmem_to_hbm [thread:$0]  %s258_s1, 1024, %s260_s23, [#allocation4], %s508_s17, %s508_s17, %s509_s18  }
  0xce   :  { %505 = dma.done.wait [#allocation4], 1024  }
  0xcf   :  { %506 = vsyncadd [#allocation4], 4294966272 }
  0xd0   :  { %270 = vsyncpa [#allocation3], 1 }
  0xd1   :  { %271 = vsyncpa [#allocation6], 1 }
  0xd2   :  { %272 = vsyncpa [#allocation4], 1 }

</bundles_post_ra>
